<compile_context>
chip_gen: v7x
topology: tpu7x:2x2x1
jax: 0.10.0
libtpu: 0.0.40
codegen_flags: <defaults>
</compile_context>

<pallas_src>
import functools

import jax
import jax.numpy as jnp
from jax.experimental import pallas as pl
from jax.experimental.pallas import tpu as pltpu

# Module-fixed hidden widths and their lane-padded sizes.
H1, H2 = 400, 300
H1P, H2P = 512, 384     # multiples of 128
OPAD = 128              # padded output width of the third weight (exact: zeros)


def _round_up(n, m):
    return ((n + m - 1) // m) * m


def _actor_kernel(action_dim, x_ref, w1_ref, w2_ref, w3_ref, b_ref, o_ref):
    """x: [tb, S] f32; w1: [S, H1P] f32; w2/w3: bf16 padded; b: [1, H1P+H2P+OPAD] f32;
    o: [tb, action_dim] f32."""
    x = x_ref[...]

    # Layer 1: Linear(S -> 400) + ReLU.  f32 on the MXU (tiny K, keeps accuracy).
    h1 = jnp.dot(x, w1_ref[...], preferred_element_type=jnp.float32)
    h1 = jnp.maximum(h1 + b_ref[:, 0:H1P], 0.0)

    # Layer 2: Linear(400 -> 300) + ReLU.  bf16 operands, f32 accumulation.
    # Padded rows/cols of w2 are zero, so the padding is exact through ReLU.
    h2 = jnp.dot(h1.astype(jnp.bfloat16), w2_ref[...],
                 preferred_element_type=jnp.float32)
    h2 = jnp.maximum(h2 + b_ref[:, H1P:H1P + H2P], 0.0)

    # Layer 3: Linear(300 -> action_dim) + tanh.  Only the real action lanes
    # get bias / tanh / store (a masked 12-lane store is far cheaper than a
    # 512 B/row f32 writeback plus a wrapper-side slice pass).
    h3 = jnp.dot(h2.astype(jnp.bfloat16), w3_ref[...],
                 preferred_element_type=jnp.float32)
    off = H1P + H2P
    y = h3[:, :action_dim] + b_ref[:, off:off + action_dim]
    o_ref[...] = jnp.tanh(y).astype(o_ref.dtype)


def prepare_actor_params(params):
    """One-time prep (at load time, NOT per call): transpose PyTorch [out,in]
    weights to [in,out], zero-pad feature dims to lane multiples, cast layer-2/3
    weights to bf16 (layer-1 stays f32 for accuracy), pack biases into one buffer."""
    state_dim = params["w1"].shape[1]
    action_dim = params["w3"].shape[0]

    def pad2(w_t, rows, cols, dtype):
        buf = jnp.zeros((rows, cols), jnp.float32)
        return buf.at[: w_t.shape[0], : w_t.shape[1]].set(w_t).astype(dtype)

    w1p = pad2(params["w1"].T, state_dim, H1P, jnp.float32)
    w2p = pad2(params["w2"].T, H1P, H2P, jnp.bfloat16)
    w3p = pad2(params["w3"].T, H2P, OPAD, jnp.bfloat16)

    bias = jnp.zeros((1, H1P + H2P + OPAD), jnp.float32)
    bias = bias.at[0, 0:H1].set(params["b1"])
    bias = bias.at[0, H1P:H1P + H2].set(params["b2"])
    bias = bias.at[0, H1P + H2P:H1P + H2P + action_dim].set(params["b3"])

    return {"w1p": w1p, "w2p": w2p, "w3p": w3p, "bias": bias,
            "state_dim": int(state_dim), "action_dim": int(action_dim)}


def _choose_batch_tiling(batch):
    """Return (tile_rows, padded_batch).  Avoid padding; for large batches use
    big tiles (amortize per-step overhead) with >=2 grid steps (v7x megacore)."""
    if batch < 512:
        return batch, batch                       # one full-array block, no pad
    for tb in (1024, 512, 256):
        if batch % tb == 0 and batch // tb >= 2:
            return tb, batch                      # exact tiling, no pad
    tb = 1024 if batch > 1024 else 512
    return tb, _round_up(batch, tb)               # last resort: pad the batch


def actor_forward(x, prepped, max_action=1.0):
    """x: [batch, state_dim] f32 -> [batch, action_dim] f32.
    (The reference forward() does not apply max_action, so neither do we.)"""
    del max_action
    batch, state_dim = x.shape
    assert state_dim == prepped["state_dim"]
    action_dim = prepped["action_dim"]

    tb, b_pad = _choose_batch_tiling(batch)
    x_in = x if b_pad == batch else jnp.pad(x, ((0, b_pad - batch), (0, 0)))

    bias_w = H1P + H2P + OPAD
    out = pl.pallas_call(
        functools.partial(_actor_kernel, action_dim),
        out_shape=jax.ShapeDtypeStruct((b_pad, action_dim), jnp.float32),
        grid=(b_pad // tb,),
        in_specs=[
            pl.BlockSpec((tb, state_dim), lambda i: (i, 0)),
            pl.BlockSpec((state_dim, H1P), lambda i: (0, 0)),  # resident weights
            pl.BlockSpec((H1P, H2P), lambda i: (0, 0)),
            pl.BlockSpec((H2P, OPAD), lambda i: (0, 0)),
            pl.BlockSpec((1, bias_w), lambda i: (0, 0)),       # packed biases
        ],
        out_specs=pl.BlockSpec((tb, action_dim), lambda i: (i, 0)),
        compiler_params=pltpu.CompilerParams(
            dimension_semantics=("parallel",)),
    )(x_in, prepped["w1p"], prepped["w2p"], prepped["w3p"], prepped["bias"])

    return out if b_pad == batch else out[:batch]


def init_actor_params(key, state_dim, action_dim):
    """Deterministic init mimicking nn.Linear's U(-1/sqrt(fan_in), 1/sqrt(fan_in)),
    stored in PyTorch convention ([out, in])."""
    ks = jax.random.split(key, 6)

    def linear_init(kw, kb, fan_in, fan_out):
        bound = 1.0 / jnp.sqrt(jnp.float32(fan_in))
        w = jax.random.uniform(kw, (fan_out, fan_in), jnp.float32, -bound, bound)
        b = jax.random.uniform(kb, (fan_out,), jnp.float32, -bound, bound)
        return w, b

    w1, b1 = linear_init(ks[0], ks[1], state_dim, H1)
    w2, b2 = linear_init(ks[2], ks[3], H1, H2)
    w3, b3 = linear_init(ks[4], ks[5], H2, action_dim)
    return {"w1": w1, "b1": b1, "w2": w2, "b2": b2, "w3": w3, "b3": b3}


def actor_reference(x, params):
    """Pure-JAX f32 reference for validation."""
    h1 = jnp.maximum(x @ params["w1"].T + params["b1"], 0.0)
    h2 = jnp.maximum(h1 @ params["w2"].T + params["b2"], 0.0)
    return jnp.tanh(h2 @ params["w3"].T + params["b3"])


if __name__ == "__main__":
    # vm_num = 4  =>  state_dim = 6*4 = 24, action_dim = 3*4 = 12
    vm_num = 4
    state_dim = 6 * vm_num
    action_dim = 3 * vm_num
    max_action = 1.0

    key = jax.random.PRNGKey(0)
    k_params, k_x, k_x2 = jax.random.split(key, 3)
    params = init_actor_params(k_params, state_dim, action_dim)
    prepped = prepare_actor_params(params)  # one-time, outside the hot path

    # Small batch: single full-array block (no pad, no slice).
    x = jax.random.normal(k_x, (2, state_dim), jnp.float32)
    out = jax.block_until_ready(actor_forward(x, prepped, max_action))
    ref = actor_reference(x, params)
    assert out.shape == (2, action_dim), out.shape
    assert jnp.allclose(out, ref, atol=2e-2, rtol=0.0), (
        "mismatch vs reference; max abs diff = "
        f"{float(jnp.max(jnp.abs(out - ref)))}")

    # Larger batch: exercises the tiled multi-step grid path (no pad needed).
    x2 = jax.random.normal(k_x2, (512, state_dim), jnp.float32)
    out2 = jax.block_until_ready(actor_forward(x2, prepped, max_action))
    ref2 = actor_reference(x2, params)
    assert out2.shape == (512, action_dim), out2.shape
    assert jnp.allclose(out2, ref2, atol=2e-2, rtol=0.0), (
        "mismatch vs reference (tiled path); max abs diff = "
        f"{float(jnp.max(jnp.abs(out2 - ref2)))}")

    print("KERNEL_OK")
</pallas_src>

<mosaic_0001>
module attributes {stable_mosaic.version = 11 : i64} {
  func.func @_actor_kernel(%arg0: i32, %arg1: memref<2x24xf32, #tpu.memory_space<vmem>>, %arg2: memref<24x512xf32, #tpu.memory_space<vmem>>, %arg3: memref<512x384xbf16, #tpu.memory_space<vmem>>, %arg4: memref<384x128xbf16, #tpu.memory_space<vmem>>, %arg5: memref<1x1024xf32, #tpu.memory_space<vmem>>, %arg6: memref<2x12xf32, #tpu.memory_space<vmem>>) attributes {dimension_semantics = [#tpu.dimension_semantics<parallel>], iteration_bounds = array<i64: 1>, scalar_prefetch = 0 : i64, scratch_operands = 0 : i64, tpu.core_type = #tpu.core_type<tc>, window_params = [{transform_indices = @transform_0, window_bounds = array<i64: 2, 24>}, {pipeline_mode = #tpu.pipeline_mode<synchronous>, transform_indices = @transform_1, window_bounds = array<i64: 24, 512>}, {pipeline_mode = #tpu.pipeline_mode<synchronous>, transform_indices = @transform_2, window_bounds = array<i64: 512, 384>}, {pipeline_mode = #tpu.pipeline_mode<synchronous>, transform_indices = @transform_3, window_bounds = array<i64: 384, 128>}, {pipeline_mode = #tpu.pipeline_mode<synchronous>, transform_indices = @transform_4, window_bounds = array<i64: 1, 1024>}, {transform_indices = @transform_5, window_bounds = array<i64: 2, 12>}]} {
    %c0 = arith.constant 0 : index
    %c0_0 = arith.constant 0 : index
    %0 = vector.load %arg1[%c0, %c0_0] : memref<2x24xf32, #tpu.memory_space<vmem>>, vector<2x24xf32>
    %c0_1 = arith.constant 0 : index
    %c0_2 = arith.constant 0 : index
    %1 = vector.load %arg2[%c0_1, %c0_2] : memref<24x512xf32, #tpu.memory_space<vmem>>, vector<24x512xf32>
    %cst = arith.constant dense<0.000000e+00> : vector<2x512xf32>
    %2 = tpu.matmul %0, %1, %cst {dimension_numbers = #tpu.dot_dimension_numbers<[1], [0], [0], [1], [0, 0, 1, 1], [], []>} : vector<2x24xf32>, vector<24x512xf32>, vector<2x512xf32> -> vector<2x512xf32>
    %c0_3 = arith.constant 0 : index
    %c0_4 = arith.constant 0 : index
    %3 = vector.load %arg5[%c0_3, %c0_4] : memref<1x1024xf32, #tpu.memory_space<vmem>>, vector<1x512xf32>
    %4 = vector.broadcast %3 : vector<1x512xf32> to vector<2x512xf32>
    %5 = arith.addf %2, %4 : vector<2x512xf32>
    %cst_5 = arith.constant 0.000000e+00 : f32
    %6 = vector.broadcast %cst_5 : f32 to vector<2x512xf32>
    %7 = arith.maximumf %5, %6 : vector<2x512xf32>
    %8 = arith.truncf %7 : vector<2x512xf32> to vector<2x512xbf16>
    %c0_6 = arith.constant 0 : index
    %c0_7 = arith.constant 0 : index
    %9 = vector.load %arg3[%c0_6, %c0_7] : memref<512x384xbf16, #tpu.memory_space<vmem>>, vector<512x384xbf16>
    %cst_8 = arith.constant dense<0.000000e+00> : vector<2x384xf32>
    %10 = tpu.matmul %8, %9, %cst_8 {dimension_numbers = #tpu.dot_dimension_numbers<[1], [0], [0], [1], [0, 0, 1, 1], [], []>} : vector<2x512xbf16>, vector<512x384xbf16>, vector<2x384xf32> -> vector<2x384xf32>
    %c0_9 = arith.constant 0 : index
    %c512 = arith.constant 512 : index
    %11 = vector.load %arg5[%c0_9, %c512] : memref<1x1024xf32, #tpu.memory_space<vmem>>, vector<1x384xf32>
    %12 = vector.broadcast %11 : vector<1x384xf32> to vector<2x384xf32>
    %13 = arith.addf %10, %12 : vector<2x384xf32>
    %cst_10 = arith.constant 0.000000e+00 : f32
    %14 = vector.broadcast %cst_10 : f32 to vector<2x384xf32>
    %15 = arith.maximumf %13, %14 : vector<2x384xf32>
    %16 = arith.truncf %15 : vector<2x384xf32> to vector<2x384xbf16>
    %c0_11 = arith.constant 0 : index
    %c0_12 = arith.constant 0 : index
    %17 = vector.load %arg4[%c0_11, %c0_12] : memref<384x128xbf16, #tpu.memory_space<vmem>>, vector<384x128xbf16>
    %cst_13 = arith.constant dense<0.000000e+00> : vector<2x128xf32>
    %18 = tpu.matmul %16, %17, %cst_13 {dimension_numbers = #tpu.dot_dimension_numbers<[1], [0], [0], [1], [0, 0, 1, 1], [], []>} : vector<2x384xbf16>, vector<384x128xbf16>, vector<2x128xf32> -> vector<2x128xf32>
    %19 = vector.extract_strided_slice %18 {offsets = [0, 0], sizes = [2, 12], strides = [1, 1]} : vector<2x128xf32> to vector<2x12xf32>
    %c0_14 = arith.constant 0 : index
    %c896 = arith.constant 896 : index
    %20 = vector.load %arg5[%c0_14, %c896] : memref<1x1024xf32, #tpu.memory_space<vmem>>, vector<1x12xf32>
    %21 = vector.broadcast %20 : vector<1x12xf32> to vector<2x12xf32>
    %22 = arith.addf %19, %21 : vector<2x12xf32>
    %23 = math.tanh %22 : vector<2x12xf32>
    %c0_15 = arith.constant 0 : index
    %c0_16 = arith.constant 0 : index
    %24 = vector.load %arg6[%c0_15, %c0_16] : memref<2x12xf32, #tpu.memory_space<vmem>>, vector<2x12xf32>
    tpu.vector_store %arg6[%c0_15, %c0_16], %23 {strides = array<i32>} : memref<2x12xf32, #tpu.memory_space<vmem>>, vector<2x12xf32>,
    return
  }
  func.func @transform_0(%arg0: i32) -> (i32, i32) {
    %c0_i32 = arith.constant 0 : i32
    %c0_i32_0 = arith.constant 0 : i32
    return %arg0, %c0_i32 : i32, i32
  }
  func.func @transform_1(%arg0: i32) -> (i32, i32) {
    %c0_i32 = arith.constant 0 : i32
    %c0_i32_0 = arith.constant 0 : i32
    %c0_i32_1 = arith.constant 0 : i32
    return %c0_i32, %c0_i32_0 : i32, i32
  }
  func.func @transform_2(%arg0: i32) -> (i32, i32) {
    %c0_i32 = arith.constant 0 : i32
    %c0_i32_0 = arith.constant 0 : i32
    %c0_i32_1 = arith.constant 0 : i32
    return %c0_i32, %c0_i32_0 : i32, i32
  }
  func.func @transform_3(%arg0: i32) -> (i32, i32) {
    %c0_i32 = arith.constant 0 : i32
    %c0_i32_0 = arith.constant 0 : i32
    %c0_i32_1 = arith.constant 0 : i32
    return %c0_i32, %c0_i32_0 : i32, i32
  }
  func.func @transform_4(%arg0: i32) -> (i32, i32) {
    %c0_i32 = arith.constant 0 : i32
    %c0_i32_0 = arith.constant 0 : i32
    %c0_i32_1 = arith.constant 0 : i32
    return %c0_i32, %c0_i32_0 : i32, i32
  }
  func.func @transform_5(%arg0: i32) -> (i32, i32) {
    %c0_i32 = arith.constant 0 : i32
    %c0_i32_0 = arith.constant 0 : i32
    return %arg0, %c0_i32 : i32, i32
  }
}

</mosaic_0001>

<bundles_post_ra>
// kernel: tpu_custom_call.1
= control target key start
LH: loop header
LB: loop body
LE: loop exit
PB: predicated region body
PF: predicated region fallthrough
CT: control target
= control target key end

     0   :  { %10 = vsyncpa [#allocation3], 0  ;;  %s2047_s0 = inlined_call_operand.hbm [shape: f32[2,24], index: 0, kind: input, shape index: {}]   ;;  %s2048_s1 = inlined_call_operand.hbm [shape: f32[24,512], index: 1, kind: input, shape index: {}]   ;;  %s2049_s2 = inlined_call_operand.hbm [shape: bf16[512,384], index: 2, kind: input, shape index: {}]   ;;  %s2050_s3 = inlined_call_operand.hbm [shape: bf16[384,128], index: 3, kind: input, shape index: {}]   ;;  %s2051_s4 = inlined_call_operand.vmem [shape: f32[1,1024], index: 4, kind: input, shape index: {}]   ;;  %s2052_s5 = inlined_call_operand.hbm [shape: f32[2,12], index: 5, kind: output, shape index: {}]  }
   0x1   :  { %11 = vsyncpa [#allocation6], 0 }
   0x2   :  { %12 = vsyncpa [#allocation9], 0 }
   0x3   :  { %13 = vsyncpa [#allocation4], 0  ;;  %s1906_s18 = smov [#allocation5]   ;;  %s1788_s22 = scalar_lea.hbm %s2048_s1, 1536 }
   0x4   :  { %s29_s19 = sshll.u32 %s1906_s18, 4  ;;  %p1789_p0 = scmp.ne.s32.totalorder %s2048_s1, %s1788_s22  ;;  %s30_s19 = int_to_ptr.vmem [resolvable:$true] %s29_s19 }
   0x5   :  { %p1792_p1 = scmp.lt.u32.totalorder %s1788_s22, %s2048_s1 }
   0x7   :  { %p1794_p2 = pnand %p1792_p1, %p1789_p0 }
   0x9   :  { %1797 = shalt.err (!%p1794_p2)
}
   0xa   :  { %s1798_s27 = scalar_lea.vmem %s30_s19, 1536  ;;  %p1803_p4 = scmp.lt.s32.totalorder %s30_s19, %s30_s19 }
   0xb   :  { %p1799_p3 = scmp.ne.s32.totalorder %s30_s19, %s1798_s27  ;;  %p1804_p5 = scmp.lt.s32.totalorder %s1798_s27, %s1798_s27 }
   0xd   :  { %p1805_p6 = por %p1804_p5, %p1803_p4 }
   0xf   :  { %p1806_p7 = pnand %p1805_p6, %p1799_p3 }
  0x11   :  { %1809 = shalt.err (!%p1806_p7)
}
  0x12   :  { %s1907_s28 = smov 512   ;;  %s1908_s29 = smov 32  }
  0x13   :  { %35 = dma.hbm_to_vmem [thread:$0]  %s2048_s1, 1536, %s30_s19, [#allocation6], %s1907_s28, %s1907_s28, %s1908_s29  }
  0x14   :  { %s1909_s7 = smov [#allocation2]   ;;  %s1910_s9 = smov [#allocation7]  }
  0x15   :  { %s20_s8 = sshll.u32 %s1909_s7, 4  ;;  %s41_s10 = sshll.u32 %s1910_s9, 4  ;;  %s21_s8 = int_to_ptr.vmem [resolvable:$true] %s20_s8  ;;  %s42_s10 = int_to_ptr.vmem [resolvable:$true] %s41_s10 }
  0x16   :  { %s1810_s13 = scalar_lea.hbm %s2047_s0, 32 }
  0x17   :  { %p1811_p8 = scmp.ne.s32.totalorder %s2047_s0, %s1810_s13  ;;  %p1814_p9 = scmp.lt.u32.totalorder %s1810_s13, %s2047_s0 }
  0x19   :  { %p1816_p10 = pnand %p1814_p9, %p1811_p8 }
  0x1b   :  { %1819 = shalt.err (!%p1816_p10)
}
  0x1c   :  { %s1820_s1 = scalar_lea.vmem %s21_s8, 32  ;;  %p1825_p12 = scmp.lt.s32.totalorder %s21_s8, %s21_s8 }
  0x1d   :  { %p1821_p11 = scmp.ne.s32.totalorder %s21_s8, %s1820_s1  ;;  %p1826_p13 = scmp.lt.s32.totalorder %s1820_s1, %s1820_s1 }
  0x1f   :  { %p1827_p0 = por %p1826_p13, %p1825_p12 }
  0x21   :  { %p1828_p1 = pnand %p1827_p0, %p1821_p11 }
  0x23   :  { %1831 = shalt.err (!%p1828_p1)
}
  0x24   :  { %23 = dma.hbm_to_vmem [thread:$0]  %s2047_s0, 32, %s21_s8, [#allocation3]  }
  0x25   :  { %s1832_s22 = scalar_lea.hbm %s2049_s2, 12288 }
  0x26   :  { %p1833_p2 = scmp.ne.s32.totalorder %s2049_s2, %s1832_s22  ;;  %p1836_p3 = scmp.lt.u32.totalorder %s1832_s22, %s2049_s2 }
  0x28   :  { %p1838_p4 = pnand %p1836_p3, %p1833_p2 }
  0x2a   :  { %1841 = shalt.err (!%p1838_p4)
}
  0x2b   :  { %s1842_s27 = scalar_lea.vmem %s42_s10, 12288  ;;  %p1847_p6 = scmp.lt.s32.totalorder %s42_s10, %s42_s10 }
  0x2c   :  { %p1843_p5 = scmp.ne.s32.totalorder %s42_s10, %s1842_s27  ;;  %p1848_p7 = scmp.lt.s32.totalorder %s1842_s27, %s1842_s27 }
  0x2e   :  { %p1849_p8 = por %p1848_p7, %p1847_p6 }
  0x30   :  { %p1850_p9 = pnand %p1849_p8, %p1843_p5 }
  0x32   :  { %1853 = shalt.err (!%p1850_p9)
}
  0x33   :  { %s1911_s0 = smov 192   ;;  %s1912_s28 = smov 12  }
  0x34   :  { %47 = dma.hbm_to_vmem [thread:$0]  %s2049_s2, 12288, %s42_s10, [#allocation6], %s1911_s0, %s1911_s0, %s1912_s28  }
  0x35   :  { %s1913_s6 = smov [#allocation8]   ;;  %s1854_s11 = scalar_lea.hbm %s2050_s3, 3072 }
  0x36   :  { %s53_s7 = sshll.u32 %s1913_s6, 4  ;;  %p1855_p10 = scmp.ne.s32.totalorder %s2050_s3, %s1854_s11  ;;  %s54_s7 = int_to_ptr.vmem [resolvable:$true] %s53_s7 }
  0x37   :  { %p1858_p11 = scmp.lt.u32.totalorder %s1854_s11, %s2050_s3 }
  0x39   :  { %p1860_p12 = pnand %p1858_p11, %p1855_p10 }
  0x3b   :  { %1863 = shalt.err (!%p1860_p12)
}
  0x3c   :  { %s1864_s16 = scalar_lea.vmem %s54_s7, 3072  ;;  %p1869_p0 = scmp.lt.s32.totalorder %s54_s7, %s54_s7 }
  0x3d   :  { %p1865_p13 = scmp.ne.s32.totalorder %s54_s7, %s1864_s16  ;;  %p1870_p1 = scmp.lt.s32.totalorder %s1864_s16, %s1864_s16 }
  0x3f   :  { %p1871_p2 = por %p1870_p1, %p1869_p0 }
  0x41   :  { %p1872_p3 = pnand %p1871_p2, %p1865_p13 }
  0x43   :  { %1875 = shalt.err (!%p1872_p3)
}
  0x44   :  { %s1914_s2 = smov 64   ;;  %s1915_s10 = smov 4  }
  0x45   :  { %59 = dma.hbm_to_vmem [thread:$0]  %s2050_s3, 3072, %s54_s7, [#allocation9], %s1914_s2, %s1914_s2, %s1915_s10  }
  0x46   :  { %1898 = dma.done.wait [#allocation3], 32  }
  0x47   :  { %1899 = vsyncadd [#allocation3], 4294967264 }
  0x48   :  { %1900 = dma.done.wait [#allocation6], 13824  }
  0x49   :  { %1901 = vsyncadd [#allocation6], 4294953472 }
  0x4a   :  { %1902 = dma.done.wait [#allocation9], 3072  }
  0x4b   :  { %1903 = vsyncadd [#allocation9], 4294964224  ;;  %v1916_v0 = vmov 0.0   ;;  %v77_v1 = vld [vmem:[#allocation5 + $0x8] sm:$0xff]  ;;  %v76_v3 = vld [vmem:[#allocation5] sm:$0xff]  ;;  %vm110_vm0 = vcmask 195584  }
  0x4c   :  { %178 = vmatprep.mubr.f32.mxu0 %v1916_v0  ;;  %249 = vmatprep.mubr.f32.mxu1 %v1916_v0  ;;  %v81_v2 = vld [vmem:[#allocation5 + $0x28] sm:$0xff]  ;;  %v80_v5 = vld [vmem:[#allocation5 + $0x20] sm:$0xff]  ;;  %v79_v8 = vld [vmem:[#allocation5 + $0x18] sm:$0xff]  ;;  %vm1917_vm1 = vmmov 0   ;;  %s1918_s23 = smov [#allocation10]   ;;  %vm1370_vm2 = vcmask 91136  }
  0x4d   :  { %v1607_v4 = vpack.c.bf16 %v81_v2, %v77_v1  ;;  %v1609_v6 = vpack.c.bf16 %v80_v5, %v76_v3  ;;  %v85_v7 = vld [vmem:[#allocation5 + $0x48] sm:$0xff]  ;;  %v83_v9 = vld [vmem:[#allocation5 + $0x38] sm:$0xff]  ;;  %v84_v10 = vld [vmem:[#allocation5 + $0x40] sm:$0xff]  ;;  %v90_v5 = vlaneseq  ;;  %s1378_s24 = sshll.u32 %s1918_s23, 4  ;;  %s1379_s24 = int_to_ptr.vmem [resolvable:$true] %s1378_s24 }
  0x4e   :  { %v1611_v11 = vpack.c.bf16 %v83_v9, %v79_v8  ;;  %v78_v12 = vld [vmem:[#allocation5 + $0x10] sm:$0xff]  ;;  %v87_v15 = vld [vmem:[#allocation5 + $0x58] sm:$0xff]  ;;  %v1634_v19 = vld [vmem:[#allocation7] ss:$12 sps:$4 sm:$0xff]   ;;  %s1876_s25 = scalar_lea.vmem %s1379_s24, 32  ;;  %p1881_p5 = scmp.lt.s32.totalorder %s1379_s24, %s1379_s24 }
  0x4f   :  { %1608 = vmatprep.subr.bf16.mxu0 %v1607_v4  ;;  %v82_v13 = vld [vmem:[#allocation5 + $0x30] sm:$0xff]  ;;  %v75_v16 = vld [vmem:[#allocation2] sm:$0x3]  ;;  %v1637_v21 = vld [vmem:[#allocation7 + $0x18] ss:$12 sps:$4 sm:$0xff]   ;;  %p1877_p4 = scmp.ne.s32.totalorder %s1379_s24, %s1876_s25  ;;  %p1882_p6 = scmp.lt.s32.totalorder %s1876_s25, %s1876_s25 }
  0x50   :  { %1610 = vmatpush1.bf16.msra.mxu0 %v1609_v6  ;;  %v1613_v14 = vpack.c.bf16 %v82_v13, %v78_v12  ;;  %1612 = vmatprep.subr.bf16.mxu1 %v1611_v11  ;;  %v1636_v17 = vld [vmem:[#allocation7 + $0x4] ss:$12 sps:$4 sm:$0xff]   ;;  %v1639_v20 = vld [vmem:[#allocation7 + $0x1c] ss:$12 sps:$4 sm:$0xff]   ;;  %v1642_v22 = vld [vmem:[#allocation7 + $0x34] ss:$12 sps:$4 sm:$0xff]  }
  0x51   :  { %118 = vmatprep.subr.mxu0 %v85_v7  ;;  %v86_v18 = vld [vmem:[#allocation5 + $0x50] sm:$0xff]  ;;  %v1645_v24 = vld [vmem:[#allocation7 + $0x4c] ss:$12 sps:$4 sm:$0xff]   ;;  %v1651_v32 = vld [vmem:[#allocation7 + $0x7c] ss:$12 sps:$4 sm:$0xff]   ;;  %v1999_v6 = vshrl.u32 %v90_v5, 7  ;;  %p1883_p7 = por %p1882_p6, %p1881_p5 }
  0x52   :  { %1614 = vmatpush1.bf16.msra.mxu1 %v1613_v14  ;;  %v1640_v23 = vld [vmem:[#allocation7 + $0x30] ss:$12 sps:$4 sm:$0xff]   ;;  %v1643_v25 = vld [vmem:[#allocation7 + $0x48] ss:$12 sps:$4 sm:$0xff]   ;;  %v1666_v29 = vld [vmem:[#allocation7 + $0xe0] ss:$12 sps:$4 sm:$0xff]  }
  0x53   :  { %189 = vmatprep.subr.mxu1 %v87_v15  ;;  %v1661_v26 = vld [vmem:[#allocation7 + $0xc8] ss:$12 sps:$4 sm:$0xff]   ;;  %v1648_v28 = vld [vmem:[#allocation7 + $0x64] ss:$12 sps:$4 sm:$0xff]   ;;  %v1667_v30 = vld [vmem:[#allocation7 + $0x20] ss:$12 sps:$4 sm:$0xff]   ;;  %p1884_p8 = pnand %p1883_p7, %p1877_p4 }
  0x54   :  { %119 = vmatpush1.msra.mxu0 %v84_v10  ;;  %v1662_v27 = vld [vmem:[#allocation7 + $0x8] ss:$12 sps:$4 sm:$0xff]   ;;  %v1646_v31 = vld [vmem:[#allocation7 + $0x60] ss:$12 sps:$4 sm:$0xff]   ;;  %v1671_v33 = vld [vmem:[#allocation7 + $0xf8] ss:$12 sps:$4 sm:$0xff]  }
  0x55   :  { %1389 = vmatmul.mubr.msk.f32.vlgmr.msra.gmra.mrb[0].mxu0 %vm110_vm0, %v75_v16  ;;  %921 = vmatprep.subr.bf16.mxu0 %v1636_v17  ;;  %v1672_v34 = vld [vmem:[#allocation7 + $0x38] ss:$12 sps:$4 sm:$0xff]   ;;  %v1654_v36 = vld [vmem:[#allocation7 + $0x94] ss:$12 sps:$4 sm:$0xff]   ;;  %v1676_v37 = vld [vmem:[#allocation7 + $0x110] ss:$12 sps:$4 sm:$0xff]  }
  0x56   :  { %190 = vmatpush1.msra.mxu1 %v86_v18  ;;  %922 = vmatpush1.bf16.msra.mxu0 %v1634_v19  ;;  %v1649_v35 = vld [vmem:[#allocation7 + $0x78] ss:$12 sps:$4 sm:$0xff]   ;;  %v1677_v38 = vld [vmem:[#allocation7 + $0x50] ss:$12 sps:$4 sm:$0xff]   ;;  %v1681_v40 = vld [vmem:[#allocation7 + $0x128] ss:$12 sps:$4 sm:$0xff]  }
  0x57   :  { %1390 = vmatmul.mubr.msk.f32.vlgmr.msra.gmra.mrb[0].mxu1 %vm110_vm0, %v75_v16  ;;  %923 = vmatprep.subr.bf16.mxu0 %v1639_v20  ;;  %v1652_v39 = vld [vmem:[#allocation7 + $0x90] ss:$12 sps:$4 sm:$0xff]   ;;  %v1657_v41 = vld [vmem:[#allocation7 + $0xac] ss:$12 sps:$4 sm:$0xff]   ;;  %v1655_v42 = vld [vmem:[#allocation7 + $0xa8] ss:$12 sps:$4 sm:$0xff]  }
  0x58   :  { %1512 = vmatprep.subr.bf16.mxu1 %v1661_v26  ;;  %v1682_v43 = vld [vmem:[#allocation7 + $0x68] ss:$12 sps:$4 sm:$0xff]   ;;  %v1686_v44 = vld [vmem:[#allocation7 + $0x140] ss:$12 sps:$4 sm:$0xff]   ;;  %v1660_v45 = vld [vmem:[#allocation7 + $0xc4] ss:$12 sps:$4 sm:$0xff]  }
  0x59   :  { %1513 = vmatpush3.bf16.msra.mxu1 %v1662_v27  ;;  %v1687_v46 = vld [vmem:[#allocation7 + $0x80] ss:$12 sps:$4 sm:$0xff]   ;;  %v1665_v48 = vld [vmem:[#allocation7 + $0xdc] ss:$12 sps:$4 sm:$0xff]   ;;  %v1663_v49 = vld [vmem:[#allocation7 + $0xd8] ss:$12 sps:$4 sm:$0xff]  }
  0x5a   :  { %924 = vmatpush1.bf16.msra.mxu0 %v1637_v21  ;;  %1514 = vmatprep.subr.bf16.mxu1 %v1666_v29  ;;  %v1658_v47 = vld [vmem:[#allocation7 + $0xc0] ss:$12 sps:$4 sm:$0xff]   ;;  %v1668_v51 = vld [vmem:[#allocation7 + $0xf0] ss:$12 sps:$4 sm:$0xff]   ;;  %v1673_v53 = vld [vmem:[#allocation7 + $0x108] ss:$12 sps:$4 sm:$0xff]  }
  0x5b   :  { %925 = vmatprep.subr.bf16.mxu0 %v1642_v22  ;;  %v1670_v50 = vld [vmem:[#allocation7 + $0xf4] ss:$12 sps:$4 sm:$0xff]   ;;  %v1675_v52 = vld [vmem:[#allocation7 + $0x10c] ss:$12 sps:$4 sm:$0xff]   ;;  %v1680_v54 = vld [vmem:[#allocation7 + $0x124] ss:$12 sps:$4 sm:$0xff]  }
  0x5c   :  { %v1678_v55 = vld [vmem:[#allocation7 + $0x120] ss:$12 sps:$4 sm:$0xff]   ;;  %v1685_v56 = vld [vmem:[#allocation7 + $0x13c] ss:$12 sps:$4 sm:$0xff]   ;;  %v1683_v57 = vld [vmem:[#allocation7 + $0x138] ss:$12 sps:$4 sm:$0xff]  }
  0x5d   :  { %1515 = vmatpush3.bf16.msra.mxu1 %v1667_v30  ;;  %v1690_v58 = vld [vmem:[#allocation7 + $0x154] ss:$12 sps:$4 sm:$0xff]   ;;  %v1691_v59 = vld [vmem:[#allocation7 + $0x158] ss:$12 sps:$4 sm:$0xff]   ;;  %v1688_v60 = vld [vmem:[#allocation7 + $0x150] ss:$12 sps:$4 sm:$0xff]  }
  0x5e   :  { %926 = vmatpush1.bf16.msra.mxu0 %v1640_v23  ;;  %1516 = vmatprep.subr.bf16.mxu1 %v1671_v33  ;;  %v1692_v61 = vld [vmem:[#allocation7 + $0x98] ss:$12 sps:$4 sm:$0xff]   ;;  %v1696_v63 = vld [vmem:[#allocation7 + $0x170] ss:$12 sps:$4 sm:$0xff]   ;;  %v1693_v1 = vld [vmem:[#allocation7 + $0x168] ss:$12 sps:$4 sm:$0xff]  }
  0x5f   :  { %927 = vmatprep.subr.bf16.mxu0 %v1645_v24  ;;  %v1695_v62 = vld [vmem:[#allocation7 + $0x16c] ss:$12 sps:$4 sm:$0xff]   ;;  %v1697_v2 = vld [vmem:[#allocation7 + $0xb0] ss:$12 sps:$4 sm:$0xff]   ;;  %v1701_v4 = vld [vmem:[#allocation7 + $0x248] ss:$12 sps:$4 sm:$0xff]  }
  0x60   :  { %v1700_v3 = vld [vmem:[#allocation7 + $0x184] ss:$12 sps:$4 sm:$0xff]   ;;  %v92_v7 = vsub.s32 0, %v1999_v6  ;;  %v88_v8 = vld [vmem:[%s2051_s4] sm:$0xf]  ;;  %v96_v9 = vsub.s32 1, %v1999_v6 }
  0x61   :  { %1517 = vmatpush3.bf16.msra.mxu1 %v1672_v34  ;;  %v104_v10 = vsub.s32 3, %v1999_v6  ;;  %v1698_v24 = vld [vmem:[#allocation7 + $0x180] ss:$12 sps:$4 sm:$0xff]   ;;  %v1711_v34 = vld [vmem:[#allocation7 + $0x278] ss:$12 sps:$4 sm:$0xff]  }
  0x62   :  { %928 = vmatpush1.bf16.msra.mxu0 %v1643_v25  ;;  %1518 = vmatprep.subr.bf16.mxu1 %v1676_v37  ;;  %v93_v11 = vrot.slane %v88_v8, %v92_v7  ;;  %v97_v12 = vrot.slane %v88_v8, %v96_v9  ;;  %v1702_v25 = vld [vmem:[#allocation7 + $0x188] ss:$12 sps:$4 sm:$0xff]   ;;  %v1706_v29 = vld [vmem:[#allocation7 + $0x260] ss:$12 sps:$4 sm:$0xff]  }
  0x63   :  { %929 = vmatprep.subr.bf16.mxu0 %v1648_v28  ;;  %v105_v14 = vrot.slane %v88_v8, %v104_v10  ;;  %v1705_v28 = vld [vmem:[#allocation7 + $0x19c] ss:$12 sps:$4 sm:$0xff]   ;;  %v1710_v33 = vld [vmem:[#allocation7 + $0x1b4] ss:$12 sps:$4 sm:$0xff]   ;;  %v1715_v37 = vld [vmem:[#allocation7 + $0x1cc] ss:$12 sps:$4 sm:$0xff]  }
  0x64   :  { %v1749_v5 = vld [vmem:[#allocation7 + $0x28c] ss:$12 sps:$4 sm:$0xff]   ;;  %v1752_v10 = vld [vmem:[#allocation7 + $0x2a4] ss:$12 sps:$4 sm:$0xff]  }
  0x65   :  { %1519 = vmatpush3.bf16.msra.mxu1 %v1677_v38  ;;  %v1716_v38 = vld [vmem:[#allocation7 + $0x290] ss:$12 sps:$4 sm:$0xff]  }
  0x66   :  { %930 = vmatpush1.bf16.msra.mxu0 %v1646_v31  ;;  %1520 = vmatprep.subr.bf16.mxu1 %v1681_v40  ;;  %v1703_v31 = vld [vmem:[#allocation7 + $0x198] ss:$12 sps:$4 sm:$0xff]   ;;  %v1717_v40 = vld [vmem:[#allocation7 + $0x1d0] ss:$12 sps:$4 sm:$0xff]  }
  0x67   :  { %931 = vmatprep.subr.bf16.mxu0 %v1651_v32  ;;  %v1707_v32 = vld [vmem:[#allocation7 + $0x1a0] ss:$12 sps:$4 sm:$0xff]  }
  0x69   :  { %1521 = vmatpush3.bf16.msra.mxu1 %v1682_v43  ;;  %v100_v43 = vsub.s32 2, %v1999_v6  ;;  %v1780_v6 = vld [vmem:[#allocation8 + $0x90] sm:$0xff]  }
  0x6a   :  { %932 = vmatpush1.bf16.msra.mxu0 %v1649_v35  ;;  %1522 = vmatprep.subr.bf16.mxu1 %v1686_v44  ;;  %v1708_v35 = vld [vmem:[#allocation7 + $0x1b0] ss:$12 sps:$4 sm:$0xff]   ;;  %v1718_v44 = vld [vmem:[#allocation7 + $0x1e0] ss:$12 sps:$4 sm:$0xff]  }
  0x6b   :  { %933 = vmatprep.subr.bf16.mxu0 %v1654_v36  ;;  %v1712_v36 = vld [vmem:[#allocation7 + $0x1b8] ss:$12 sps:$4 sm:$0xff]  }
  0x6d   :  { %1523 = vmatpush3.bf16.msra.mxu1 %v1687_v46  ;;  %v1725_v46 = vld [vmem:[#allocation7 + $0x1fc] ss:$12 sps:$4 sm:$0xff]  }
  0x6e   :  { %934 = vmatpush1.bf16.msra.mxu0 %v1652_v39  ;;  %1524 = vmatprep.subr.bf16.mxu1 %v1691_v59  ;;  %v1713_v39 = vld [vmem:[#allocation7 + $0x1c8] ss:$12 sps:$4 sm:$0xff]  }
  0x6f   :  { %935 = vmatprep.subr.bf16.mxu0 %v1657_v41  ;;  %v1720_v41 = vld [vmem:[#allocation7 + $0x1e4] ss:$12 sps:$4 sm:$0xff]   ;;  %v1733_v59 = vld [vmem:[#allocation7 + $0x228] ss:$12 sps:$4 sm:$0xff]  }
  0x71   :  { %1525 = vmatpush3.bf16.msra.mxu1 %v1692_v61  ;;  %v1740_v61 = vld [vmem:[#allocation7 + $0x244] ss:$12 sps:$4 sm:$0xff]  }
  0x72   :  { %936 = vmatpush1.bf16.msra.mxu0 %v1655_v42  ;;  %1526 = vmatprep.subr.bf16.mxu1 %v1696_v63  ;;  %v1721_v42 = vld [vmem:[#allocation7 + $0x2a8] ss:$12 sps:$4 sm:$0xff]   ;;  %v1738_v63 = vld [vmem:[#allocation7 + $0x240] ss:$12 sps:$4 sm:$0xff]  }
  0x73   :  { %937 = vmatprep.subr.bf16.mxu0 %v1660_v45  ;;  %v1722_v45 = vld [vmem:[#allocation7 + $0x1e8] ss:$12 sps:$4 sm:$0xff]  }
  0x75   :  { %1527 = vmatpush3.bf16.msra.mxu1 %v1697_v2  ;;  %v1741_v2 = vld [vmem:[#allocation7 + $0x258] ss:$12 sps:$4 sm:$0xff]  }
  0x76   :  { %938 = vmatpush1.bf16.msra.mxu0 %v1658_v47  ;;  %1534 = vmatprep.subr.bf16.mxu1 %v1701_v4  ;;  %v1726_v47 = vld [vmem:[#allocation7 + $0x2c0] ss:$12 sps:$4 sm:$0xff]   ;;  %v1744_v4 = vld [vmem:[#allocation7 + $0x270] ss:$12 sps:$4 sm:$0xff]  }
  0x77   :  { %939 = vmatprep.subr.bf16.mxu0 %v1665_v48  ;;  %v101_v48 = vrot.slane %v88_v8, %v100_v43  ;;  %v1747_v8 = vld [vmem:[#allocation7 + $0x288] ss:$12 sps:$4 sm:$0xff]  }
  0x7a   :  { %940 = vmatpush1.bf16.msra.mxu0 %v1663_v49  ;;  %v1723_v49 = vld [vmem:[#allocation7 + $0x1f8] ss:$12 sps:$4 sm:$0xff]  }
  0x7b   :  { %941 = vmatprep.subr.bf16.mxu0 %v1670_v50  ;;  %v1727_v50 = vld [vmem:[#allocation7 + $0x200] ss:$12 sps:$4 sm:$0xff]  }
  0x7e   :  { %942 = vmatpush1.bf16.msra.mxu0 %v1668_v51  ;;  %v1730_v51 = vld [vmem:[#allocation7 + $0x214] ss:$12 sps:$4 sm:$0xff]  }
  0x7f   :  { %943 = vmatprep.subr.bf16.mxu0 %v1675_v52  ;;  %v1731_v52 = vld [vmem:[#allocation7 + $0x2d8] ss:$12 sps:$4 sm:$0xff]  }
  0x82   :  { %944 = vmatpush1.bf16.msra.mxu0 %v1673_v53 }
  0x83   :  { %945 = vmatprep.subr.bf16.mxu0 %v1680_v54  ;;  %v1728_v54 = vld [vmem:[#allocation7 + $0x210] ss:$12 sps:$4 sm:$0xff]  }
  0x86   :  { %946 = vmatpush1.bf16.msra.mxu0 %v1678_v55  ;;  %v1732_v55 = vld [vmem:[#allocation7 + $0x218] ss:$12 sps:$4 sm:$0xff]  }
  0x87   :  { %947 = vmatprep.subr.bf16.mxu0 %v1685_v56  ;;  %v1735_v56 = vld [vmem:[#allocation7 + $0x22c] ss:$12 sps:$4 sm:$0xff]  }
  0x8a   :  { %948 = vmatpush1.bf16.msra.mxu0 %v1683_v57  ;;  %v1736_v57 = vld [vmem:[#allocation7 + $0x2f0] ss:$12 sps:$4 sm:$0xff]  }
  0x8b   :  { %949 = vmatprep.subr.bf16.mxu0 %v1690_v58 }
  0x8e   :  { %950 = vmatpush1.bf16.msra.mxu0 %v1688_v60  ;;  %v1737_v60 = vld [vmem:[#allocation7 + $0x230] ss:$12 sps:$4 sm:$0xff]  }
  0x8f   :  { %951 = vmatprep.subr.bf16.mxu0 %v1695_v62 }
  0x92   :  { %952 = vmatpush1.bf16.msra.mxu0 %v1693_v1  ;;  %v1743_v1 = vld [vmem:[#allocation7 + $0x25c] ss:$12 sps:$4 sm:$0xff]  }
  0x93   :  { %962 = vmatprep.subr.bf16.mxu0 %v1700_v3  ;;  %v1746_v3 = vld [vmem:[#allocation7 + $0x274] ss:$12 sps:$4 sm:$0xff]  }
 0x128   :  { %v180_v13 = vpop.f32.mrb[0].mxu0 }
 0x129   :  { %v181_v15 = vadd.f32 %v180_v13, %v93_v11  ;;  %v182_v16 = vpop.f32.mrb[1].mxu0  ;;  %v1750_v11 = vld [vmem:[#allocation7 + $0x2a0] ss:$12 sps:$4 sm:$0xff]   ;;  %v1753_v13 = vld [vmem:[#allocation7 + $0x2b8] ss:$12 sps:$4 sm:$0xff]  }
 0x12a   :  { %v183_v17 = vadd.f32 %v182_v16, %v97_v12  ;;  %v251_v18 = vpop.f32.mrb[0].mxu1  ;;  %v1755_v12 = vld [vmem:[#allocation7 + $0x2bc] ss:$12 sps:$4 sm:$0xff]   ;;  %v1761_v16 = vld [vmem:[#allocation7 + $0x2ec] ss:$12 sps:$4 sm:$0xff]  }
 0x12b   :  { %v256_v19 = vmax.f32 %v181_v15, 0.0  ;;  %v253_v20 = vpop.f32.mrb[1].mxu1  ;;  %v252_v53 = vadd.f32 %v251_v18, %v101_v48  ;;  %v1756_v15 = vld [vmem:[#allocation7 + $0x2d0] ss:$12 sps:$4 sm:$0xff]   ;;  %v1762_v18 = vld [vmem:[#allocation8 + $0x40] sm:$0xff]  }
 0x12c   :  { %v257_v21 = vmax.f32 %v183_v17, 0.0  ;;  %v254_v22 = vadd.f32 %v253_v20, %v105_v14  ;;  %v1758_v14 = vld [vmem:[#allocation7 + $0x2d4] ss:$12 sps:$4 sm:$0xff]   ;;  %v1764_v20 = vld [vmem:[#allocation8 + $0x48] sm:$0xff]  }
 0x12d   :  { %v260_v27 = vpack.c.bf16 %v256_v19, %v256_v19  ;;  %v258_v58 = vmax.f32 %v252_v53, 0.0  ;;  %v1759_v17 = vld [vmem:[#allocation7 + $0x2e8] ss:$12 sps:$4 sm:$0xff]   ;;  %v1763_v19 = vld [vmem:[#allocation8] sm:$0xff]  }
 0x12e   :  { %v261_v23 = vpack.c.bf16 %v257_v21, %v257_v21  ;;  %v259_v26 = vmax.f32 %v254_v22, 0.0  ;;  %v1765_v21 = vld [vmem:[#allocation8 + $0x8] sm:$0xff]   ;;  %v1766_v22 = vld [vmem:[#allocation8 + $0x50] sm:$0xff]  }
 0x12f   :  { %v262_v62 = vpack.c.bf16 %v258_v58, %v258_v58 }
 0x130   :  { %953 = vmatprep.mubr.bf16.mxu0 %v261_v23  ;;  %1035 = vmatprep.mubr.bf16.mxu1 %v261_v23  ;;  %v263_v30 = vpack.c.bf16 %v259_v26, %v259_v26  ;;  %v1767_v23 = vld [vmem:[#allocation8 + $0x10] sm:$0xff]   ;;  %v1770_v26 = vld [vmem:[#allocation8 + $0x60] sm:$0xff]  }
 0x131   :  { %954 = vmatmul.mubr.bf16.vlgmr.msra.gmra.mrb[4].mxu0 %v260_v27  ;;  %1036 = vmatmul.mubr.bf16.vlgmr.msra.gmra.mrb[4].mxu1 %v260_v27  ;;  %v1771_v27 = vld [vmem:[#allocation8 + $0x20] sm:$0xff]  }
 0x132   :  { %963 = vmatpush1.bf16.msra.mxu0 %v1698_v24  ;;  %1535 = vmatpush3.bf16.msra.mxu1 %v1702_v25  ;;  %v1768_v24 = vld [vmem:[#allocation8 + $0x58] sm:$0xff]  }
 0x133   :  { %964 = vmatprep.subr.bf16.mxu0 %v1705_v28  ;;  %1536 = vmatprep.subr.bf16.mxu1 %v1706_v29  ;;  %v1769_v25 = vld [vmem:[#allocation8 + $0x18] sm:$0xff]   ;;  %v1772_v28 = vld [vmem:[#allocation8 + $0x68] sm:$0xff]  }
 0x134   :  { %1075 = vmatprep.mubr.bf16.mxu1 %v263_v30  ;;  %994 = vmatprep.mubr.bf16.mxu0 %v263_v30  ;;  %v1773_v29 = vld [vmem:[#allocation8 + $0x28] sm:$0xff]   ;;  %v1774_v30 = vld [vmem:[#allocation8 + $0x70] sm:$0xff]  }
 0x136   :  { %965 = vmatpush1.bf16.msra.mxu0 %v1703_v31  ;;  %1537 = vmatpush3.bf16.msra.mxu1 %v1707_v32  ;;  %v1775_v31 = vld [vmem:[#allocation8 + $0x30] sm:$0xff]   ;;  %v1776_v32 = vld [vmem:[#allocation8 + $0x78] sm:$0xff]  }
 0x137   :  { %966 = vmatprep.subr.bf16.mxu0 %v1710_v33  ;;  %1538 = vmatprep.subr.bf16.mxu1 %v1711_v34  ;;  %v1777_v33 = vld [vmem:[#allocation8 + $0x38] sm:$0xff]  }
 0x13a   :  { %967 = vmatpush1.bf16.msra.mxu0 %v1708_v35  ;;  %1539 = vmatpush3.bf16.msra.mxu1 %v1712_v36 }
 0x13b   :  { %968 = vmatprep.subr.bf16.mxu0 %v1715_v37  ;;  %1540 = vmatprep.subr.bf16.mxu1 %v1716_v38 }
 0x13e   :  { %969 = vmatpush1.bf16.msra.mxu0 %v1713_v39  ;;  %1541 = vmatpush3.bf16.msra.mxu1 %v1717_v40  ;;  %v392_v39 = vld [vmem:[%s2051_s4 + $0x4] sm:$0x7] }
 0x13f   :  { %970 = vmatprep.subr.bf16.mxu0 %v1720_v41  ;;  %1542 = vmatprep.subr.bf16.mxu1 %v1721_v42  ;;  %v405_v40 = vrot.slane %v392_v39, %v100_v43 }
 0x142   :  { %971 = vmatpush1.bf16.msra.mxu0 %v1718_v44  ;;  %1543 = vmatpush3.bf16.msra.mxu1 %v1722_v45 }
 0x143   :  { %972 = vmatprep.subr.bf16.mxu0 %v1725_v46  ;;  %1544 = vmatprep.subr.bf16.mxu1 %v1726_v47 }
 0x146   :  { %973 = vmatpush1.bf16.msra.mxu0 %v1723_v49  ;;  %1545 = vmatpush3.bf16.msra.mxu1 %v1727_v50  ;;  %v397_v49 = vrot.slane %v392_v39, %v92_v7  ;;  %v401_v50 = vrot.slane %v392_v39, %v96_v9  ;;  %v1781_v7 = vld [vmem:[#allocation8 + $0x98] sm:$0xff]   ;;  %v1782_v9 = vld [vmem:[#allocation8 + $0xa0] sm:$0xff]  }
 0x147   :  { %974 = vmatprep.subr.bf16.mxu0 %v1730_v51  ;;  %1546 = vmatprep.subr.bf16.mxu1 %v1731_v52 }
 0x14a   :  { %975 = vmatpush1.bf16.msra.mxu0 %v1728_v54  ;;  %1547 = vmatpush3.bf16.msra.mxu1 %v1732_v55 }
 0x14b   :  { %976 = vmatprep.subr.bf16.mxu0 %v1735_v56  ;;  %1548 = vmatprep.subr.bf16.mxu1 %v1736_v57 }
 0x14e   :  { %977 = vmatpush1.bf16.msra.mxu0 %v1733_v59  ;;  %1549 = vmatpush3.bf16.msra.mxu1 %v1737_v60  ;;  %v1778_v59 = vld [vmem:[#allocation8 + $0x80] sm:$0xff]  }
 0x14f   :  { %978 = vmatprep.subr.bf16.mxu0 %v1740_v61  ;;  %1556 = vmatprep.subr.bf16.mxu1 %v1762_v18  ;;  %v1779_v61 = vld [vmem:[#allocation8 + $0x88] sm:$0xff]  }
 0x151   :  { %1076 = vmatmul.mubr.bf16.vlgmr.msra.gmra.mrb[8].mxu1 %v262_v62 }
 0x152   :  { %979 = vmatpush1.bf16.msra.mxu0 %v1738_v63  ;;  %1557 = vmatpush3.bf16.msra.mxu1 %v1763_v19  ;;  %v1784_v63 = vld [vmem:[#allocation8 + $0xb0] sm:$0xff]  }
 0x153   :  { %980 = vmatprep.subr.bf16.mxu0 %v1743_v1  ;;  %1558 = vmatprep.subr.bf16.mxu1 %v1764_v20  ;;  %v1785_v1 = vld [vmem:[#allocation8 + $0xb8] sm:$0xff]  }
 0x156   :  { %981 = vmatpush1.bf16.msra.mxu0 %v1741_v2  ;;  %1559 = vmatpush3.bf16.msra.mxu1 %v1765_v21 }
 0x157   :  { %982 = vmatprep.subr.bf16.mxu0 %v1746_v3  ;;  %1560 = vmatprep.subr.bf16.mxu1 %v1766_v22 }
 0x15a   :  { %983 = vmatpush1.bf16.msra.mxu0 %v1744_v4  ;;  %1561 = vmatpush3.bf16.msra.mxu1 %v1767_v23 }
 0x15b   :  { %984 = vmatprep.subr.bf16.mxu0 %v1749_v5  ;;  %1562 = vmatprep.subr.bf16.mxu1 %v1768_v24 }
 0x15e   :  { %985 = vmatpush1.bf16.msra.mxu0 %v1747_v8  ;;  %1563 = vmatpush3.bf16.msra.mxu1 %v1769_v25 }
 0x15f   :  { %986 = vmatprep.subr.bf16.mxu0 %v1752_v10  ;;  %1564 = vmatprep.subr.bf16.mxu1 %v1770_v26 }
 0x162   :  { %987 = vmatpush1.bf16.msra.mxu0 %v1750_v11  ;;  %1565 = vmatpush3.bf16.msra.mxu1 %v1771_v27 }
 0x163   :  { %988 = vmatprep.subr.bf16.mxu0 %v1755_v12  ;;  %1566 = vmatprep.subr.bf16.mxu1 %v1772_v28 }
 0x166   :  { %989 = vmatpush1.bf16.msra.mxu0 %v1753_v13  ;;  %1567 = vmatpush3.bf16.msra.mxu1 %v1773_v29  ;;  %v1511_v13 = vld [vmem:[%s2051_s4 + $0x7] ss:$0 sm:$0xff] }
 0x167   :  { %990 = vmatprep.subr.bf16.mxu0 %v1758_v14  ;;  %1568 = vmatprep.subr.bf16.mxu1 %v1774_v30 }
 0x16a   :  { %991 = vmatpush1.bf16.msra.mxu0 %v1756_v15  ;;  %1569 = vmatpush3.bf16.msra.mxu1 %v1775_v31 }
 0x16b   :  { %992 = vmatprep.subr.bf16.mxu0 %v1761_v16  ;;  %1570 = vmatprep.subr.bf16.mxu1 %v1776_v32 }
 0x16e   :  { %993 = vmatpush1.bf16.msra.mxu0 %v1759_v17  ;;  %1571 = vmatpush3.bf16.msra.mxu1 %v1777_v33 }
 0x16f   :  { %1587 = vmatprep.subr.bf16.mxu1 %v1916_v0 }
 0x171   :  { %995 = vmatmul.mubr.bf16.vlgmr.msra.gmra.mrb[4].mxu0 %v262_v62  ;;  %v1783_v62 = vld [vmem:[#allocation8 + $0xa8] sm:$0xff]  }
 0x204   :  { %v1528_v34 = vpop.f32.mrb[4].mxu1 }
 0x205   :  { %v1529_v35 = vpop.f32.mrb[5].mxu1 }
 0x206   :  { %v1530_v36 = vadd.f32 %v1529_v35, %v1528_v34  ;;  %v1531_v37 = vpop.f32.mrb[6].mxu1 }
 0x207   :  { %v1532_v38 = vpop.f32.mrb[7].mxu1 }
 0x208   :  { %v1038_v44 = vadd.f32 %v1530_v36, %v405_v40 }
 0x224   :  { %v1550_v41 = vpop.f32.mrb[8].mxu1 }
 0x225   :  { %v1551_v42 = vpop.f32.mrb[9].mxu1 }
 0x226   :  { %v1552_v45 = vadd.f32 %v1551_v42, %v1550_v41  ;;  %v1553_v46 = vpop.f32.mrb[10].mxu1 }
 0x227   :  { %v1554_v47 = vpop.f32.mrb[11].mxu1 }
 0x228   :  { %v1078_v48 = vadd.f32 %v1552_v45, %v1038_v44 }
 0x22a   :  { %v1085_v2 = vmax.f32 %v1078_v48, 0.0 }
 0x22c   :  { %v1088_v3 = vpack.c.bf16 %v1085_v2, %v1085_v2 }
 0x244   :  { %v996_v51 = vpop.f32.mrb[4].mxu0 }
 0x245   :  { %v1615_v52 = vadd.f32 %v996_v51, %v397_v49  ;;  %v998_v53 = vpop.f32.mrb[5].mxu0 }
 0x246   :  { %v1616_v54 = vadd.f32 %v998_v53, %v401_v50  ;;  %v1000_v55 = vpop.f32.mrb[6].mxu0 }
 0x247   :  { %v1083_v56 = vmax.f32 %v1615_v52, 0.0  ;;  %v1001_v43 = vpop.f32.mrb[7].mxu0 }
 0x248   :  { %v1084_v57 = vmax.f32 %v1616_v54, 0.0 }
 0x249   :  { %v1086_v60 = vpack.c.bf16 %v1083_v56, %v1083_v56 }
 0x24a   :  { %v1087_v58 = vpack.c.bf16 %v1084_v57, %v1084_v57 }
 0x24c   :  { %1313 = vmatprep.mubr.bf16.mxu1 %v1087_v58 }
 0x24d   :  { %1314 = vmatmul.mubr.bf16.vlgmr.msra.gmra.mrb[12].mxu1 %v1086_v60 }
 0x24e   :  { %1588 = vmatpush3.bf16.msra.mxu1 %v1778_v59  ;;  %1603 = vmatprep.mubr.msk.bf16.mxu1 %vm1917_vm1, %v1916_v0 }
 0x24f   :  { %1589 = vmatprep.subr.bf16.mxu1 %v1916_v0 }
 0x252   :  { %1590 = vmatpush3.bf16.msra.mxu1 %v1779_v61 }
 0x253   :  { %1591 = vmatprep.subr.bf16.mxu1 %v1916_v0 }
 0x256   :  { %1592 = vmatpush3.bf16.msra.mxu1 %v1780_v6 }
 0x257   :  { %1593 = vmatprep.subr.bf16.mxu1 %v1916_v0 }
 0x25a   :  { %1594 = vmatpush3.bf16.msra.mxu1 %v1781_v7 }
 0x25b   :  { %1595 = vmatprep.subr.bf16.mxu1 %v1916_v0 }
 0x25e   :  { %1596 = vmatpush3.bf16.msra.mxu1 %v1782_v9 }
 0x25f   :  { %1597 = vmatprep.subr.bf16.mxu1 %v1916_v0 }
 0x262   :  { %1598 = vmatpush3.bf16.msra.mxu1 %v1783_v62 }
 0x263   :  { %1599 = vmatprep.subr.bf16.mxu1 %v1916_v0 }
 0x266   :  { %1600 = vmatpush3.bf16.msra.mxu1 %v1784_v63 }
 0x267   :  { %1601 = vmatprep.subr.bf16.mxu1 %v1916_v0 }
 0x26a   :  { %1602 = vmatpush3.bf16.msra.mxu1 %v1785_v1 }
 0x26d   :  { %1604 = vmatmul.mubr.bf16.vlgmr.msra.gmra.mrb[16].mxu1 %v1088_v3 }
 0x320   :  { %v1572_v4 = vpop.f32.mrb[12].mxu1 }
 0x321   :  { %v1573_v5 = vpop.f32.mrb[13].mxu1 }
 0x322   :  { %v1574_v8 = vadd.f32 %v1573_v5, %v1572_v4  ;;  %v1575_v10 = vpop.f32.mrb[14].mxu1 }
 0x323   :  { %v1576_v11 = vpop.f32.mrb[15].mxu1 }
 0x340   :  { %v1355_v12 = vpop.f32.mrb[16].mxu1 }
 0x341   :  { %v1356_v14 = vadd.f32 %v1574_v8, %v1355_v12  ;;  %v1605_v15 = vpop.f32.mrb[17].mxu1 }
 0x342   :  { %v1358_v16 = vpop.f32.mrb[18].mxu1 }
 0x343   :  { %v1368_v17 = vadd.f32 %v1511_v13, %v1356_v14  ;;  %v1606_v18 = vpop.f32.mrb[19].mxu1 }
 0x345   :  { %1786 = vtanh.f32 %v1368_v17 }
 0x34f   :  { %v1787_v0 = vpop.eup %1786 }
 0x350   :  { %1371 = vst.msk [vmem:[#allocation10] sm:$0x3] %vm1370_vm2, %v1787_v0 }
 0x351   :  { %1887 = shalt.err (!%p1884_p8)
}
 0x352   :  { %s1888_s27 = scalar_lea.hbm %s2052_s5, 32 }
 0x353   :  { %p1889_p9 = scmp.ne.s32.totalorder %s2052_s5, %s1888_s27  ;;  %p1892_p10 = scmp.lt.u32.totalorder %s1888_s27, %s2052_s5 }
 0x355   :  { %p1894_p11 = pnand %p1892_p10, %p1889_p9 }
 0x357   :  { %1897 = shalt.err (!%p1894_p11)
}
 0x358   :  { %1381 = dma.vmem_to_hbm [thread:$0]  %s1379_s24, 32, %s2052_s5, [#allocation4]  }
 0x359   :  { %1904 = dma.done.wait [#allocation4], 32  }
 0x35a   :  { %1905 = vsyncadd [#allocation4], 4294967264 }
 0x35b   :  { %1385 = vsyncpa [#allocation3], 1 }
 0x35c   :  { %1386 = vsyncpa [#allocation6], 1 }
 0x35d   :  { %1387 = vsyncpa [#allocation9], 1 }
 0x35e   :  { %1388 = vsyncpa [#allocation4], 1 }

</bundles_post_ra>
